<compile_context>
chip_gen: v7x
topology: tpu7x:2x2x1
jax: 0.10.0
libtpu: 0.0.40
codegen_flags: <defaults>
</compile_context>

<pallas_src>
import functools
import math
from collections import namedtuple

import jax
import jax.numpy as jnp
from jax.experimental import pallas as pl
from jax.experimental.pallas import tpu as pltpu


def _round_up(x, m):
    return (x + m - 1) // m * m


def _cdiv(a, b):
    return -(-a // b)


def _log_sigmoid(x):
    # Numerically stable log(sigmoid(x)) = min(x, 0) - log1p(exp(-|x|)).
    return jnp.minimum(x, 0.0) - jnp.log1p(jnp.exp(-jnp.abs(x)))


_Plan = namedtuple("_Plan", "e_pad tn tiles_per_core num_cores n_pad vmem_limit")


def _tpu_hw():
    """(physical VMEM bytes, TensorCores per chip) with safe fallbacks."""
    vmem = 64 * 1024 * 1024          # conservative (v7x-sized) fallback
    cores = 1
    try:
        vmem = int(getattr(pltpu.get_tpu_info(), "vmem_capacity_bytes", vmem))
    except Exception:
        pass
    try:
        # Only v7x has 2 TensorCores per chip; v5e/v6e keep num_cores=1 so the
        # "parallel" axis does not add padded tiles / extra partial-sum writes.
        if "v7" in jax.devices()[0].device_kind.lower():
            cores = 2
    except Exception:
        pass
    return vmem, cores


def _plan(n, e, s, w_itemsize, x_itemsize, *, block_rows=None, num_cores=None):
    """Derive row-tile size, grid shape and VMEM budget for the current chip."""
    e_pad = _round_up(e, 128)
    phys_vmem, hw_cores = _tpu_hw()
    if num_cores is None:
        num_cores = hw_cores
    # Bytes of double-buffered input blocks per tile row (embs + pos + S negs).
    per_row = 2 * e_pad * (x_itemsize + w_itemsize * (1 + s))
    budget = min(phys_vmem // 2, 96 * 1024 * 1024)
    cap = 2048 if block_rows is None else block_rows
    tn = max(8, min((budget // per_row) // 8 * 8, cap, _round_up(n, 8)))
    tiles_total = _cdiv(n, tn)
    num_cores = max(1, min(num_cores, tiles_total))
    tiles_per_core = _cdiv(tiles_total, num_cores)
    n_pad = num_cores * tiles_per_core * tn
    working = per_row * tn + 2 * 8 * 128 * 4 + (1 << 16)
    vmem_limit = int(min(phys_vmem - (2 << 20), max(32 << 20, working + (8 << 20))))
    vmem_limit = max(vmem_limit, working + (2 << 20))
    return _Plan(e_pad, tn, tiles_per_core, num_cores, n_pad, vmem_limit)


def _nsloss_kernel(embs_ref, pos_w_ref, neg_w_ref, out_ref, acc_ref, *,
                   n_true, n_pad, tn, tiles_per_core, num_sampled, e_pad):
    c = pl.program_id(0)   # TensorCore / partial-sum index ("parallel")
    t = pl.program_id(1)   # row-tile index within the core ("arbitrary")

    @pl.when(t == 0)
    def _init():
        acc_ref[...] = jnp.zeros_like(acc_ref)

    embs = embs_ref[...].astype(jnp.float32)        # (tn, e_pad)
    pos_w = pos_w_ref[...].astype(jnp.float32)      # (tn, e_pad)

    # Per-row scores for the positive and the S negatives, packed into one
    # lane-dense (tn, S+1) block so the exp/log of the log-sigmoid hits the
    # single EUP slot once instead of S+1 times on lane-sparse (tn, 1) columns.
    cols = [jnp.sum(embs * pos_w, axis=-1, keepdims=True)]
    for s in range(num_sampled):
        # Static 128-aligned lane slice of the (tn, S*E_pad) slab: no
        # (tn, S, E_pad) f32 temporary is ever materialized.
        neg_s = neg_w_ref[:, s * e_pad:(s + 1) * e_pad].astype(jnp.float32)
        cols.append(-jnp.sum(embs * neg_s, axis=-1, keepdims=True))
    lsig = _log_sigmoid(jnp.concatenate(cols, axis=-1))          # (tn, S+1)

    if n_pad == n_true:
        acc_ref[...] += jnp.sum(lsig, keepdims=True)
    else:
        # Only tiles at/after the n_true boundary contain padded rows; the
        # iota/compare/select mask is runtime-skipped for all earlier tiles.
        first_pad_tile = n_true // tn
        g = c * tiles_per_core + t

        @pl.when(g < first_pad_tile)
        def _full():
            acc_ref[...] += jnp.sum(lsig, keepdims=True)

        @pl.when(g >= first_pad_tile)
        def _partial():
            row_ids = g * tn + jax.lax.broadcasted_iota(jnp.int32, (tn, 1), 0)
            rows = jnp.sum(lsig, axis=-1, keepdims=True)          # (tn, 1)
            acc_ref[...] += jnp.sum(
                jnp.where(row_ids < n_true, rows, 0.0), keepdims=True)

    @pl.when(t == tiles_per_core - 1)
    def _finalize():
        # Write the per-core partial sum once, lane/sublane aligned.
        out_ref[...] = jnp.broadcast_to(acc_ref[...], out_ref.shape)


def _nsloss_call(embs, pos_w, neg_w2, *, n_true, plan):
    """Low-level entry. Arrays must already be row-padded to plan.n_pad and
    lane-padded to plan.e_pad; neg_w2 is flattened to (n_pad, S * e_pad)."""
    n_pad, e_pad, tn = plan.n_pad, plan.e_pad, plan.tn
    tpc, nc = plan.tiles_per_core, plan.num_cores
    s = neg_w2.shape[1] // e_pad
    assert embs.shape == (n_pad, e_pad) and pos_w.shape == (n_pad, e_pad)
    assert neg_w2.shape == (n_pad, s * e_pad)

    kernel = functools.partial(
        _nsloss_kernel, n_true=n_true, n_pad=n_pad, tn=tn,
        tiles_per_core=tpc, num_sampled=s, e_pad=e_pad)

    x_item = jnp.dtype(embs.dtype).itemsize
    w_item = jnp.dtype(pos_w.dtype).itemsize
    cost = pl.CostEstimate(
        flops=2 * n_pad * (s + 1) * e_pad,
        transcendentals=2 * n_pad * (s + 1),
        bytes_accessed=n_pad * e_pad * (x_item + (s + 1) * w_item)
        + nc * 8 * 128 * 4)

    out_tiles = pl.pallas_call(
        kernel,
        out_shape=jax.ShapeDtypeStruct((nc * 8, 128), jnp.float32),
        grid=(nc, tpc),
        in_specs=[
            pl.BlockSpec((tn, e_pad), lambda c, t: (c * tpc + t, 0)),
            pl.BlockSpec((tn, e_pad), lambda c, t: (c * tpc + t, 0)),
            pl.BlockSpec((tn, s * e_pad), lambda c, t: (c * tpc + t, 0)),
        ],
        out_specs=pl.BlockSpec((8, 128), lambda c, t: (c, 0)),
        scratch_shapes=[pltpu.VMEM((1, 1), jnp.float32)],
        compiler_params=pltpu.CompilerParams(
            dimension_semantics=("parallel", "arbitrary"),
            vmem_limit_bytes=plan.vmem_limit),
        cost_estimate=cost,
    )(embs, pos_w, neg_w2)

    partials = out_tiles.reshape(nc, 8, 128)[:, 0, 0]             # (nc,)
    return -jnp.sum(partials) / jnp.float32(n_true)


def nsloss_pallas(embs, pos_w, neg_w, *, block_rows=None, num_cores=None):
    """Convenience wrapper for unpadded inputs.

    embs: (n, E)    pos_w: (n, E)    neg_w: (n, S, E)
    (Prefer NSLossPallas.__call__, which pads the index vectors instead of the
    gathered slabs.)
    """
    n, e = embs.shape
    s = neg_w.shape[1]
    plan = _plan(n, e, s, jnp.dtype(pos_w.dtype).itemsize,
                 jnp.dtype(embs.dtype).itemsize,
                 block_rows=block_rows, num_cores=num_cores)
    e_pad, n_pad = plan.e_pad, plan.n_pad
    embs = jnp.pad(embs, ((0, n_pad - n), (0, e_pad - e)))
    pos_w = jnp.pad(pos_w, ((0, n_pad - n), (0, e_pad - e)))
    neg_w = jnp.pad(neg_w, ((0, n_pad - n), (0, 0), (0, e_pad - e)))
    return _nsloss_call(embs, pos_w, neg_w.reshape(n_pad, s * e_pad),
                        n_true=n, plan=plan)


class NSLossPallas:
    """JAX/Pallas re-implementation of the PyTorch NSLoss module (forward)."""

    def __init__(self, num_nodes, node_freq, num_sampled, embedding_size, key,
                 weight_dtype=jnp.bfloat16):
        self.num_nodes = num_nodes
        self.num_sampled = num_sampled
        self.embedding_size = embedding_size
        self.e_pad = _round_up(embedding_size, 128)
        # reset_parameters(): normal(std = 1/sqrt(embedding_size))
        w = (jax.random.normal(key, (num_nodes, embedding_size), dtype=jnp.float32)
             / math.sqrt(embedding_size))
        # bf16 weights halve the HBM traffic of this memory-bound op (weights are
        # (S+1)/(S+2) of the streamed bytes); the kernel upcasts to f32 internally.
        # Pass weight_dtype=jnp.float32 to match PyTorch numerics bit-for-bit.
        self.weights = w.astype(weight_dtype)
        # Lane-dense padded table used by the kernel path (padded lanes are 0,
        # so they contribute 0 to every dot product).
        self.weights_padded = jnp.pad(
            self.weights, ((0, 0), (0, self.e_pad - embedding_size)))
        node_freq = jnp.asarray(node_freq, jnp.float32)
        # Matches the reference exactly: freq**0.75 normalized by sum of raw freq.
        self.sample_weights = (node_freq ** 0.75) / jnp.sum(node_freq)

    def __call__(self, n, embs, label, key=None, negs=None):
        s, e_pad = self.num_sampled, self.e_pad
        plan = _plan(n, self.embedding_size, s,
                     jnp.dtype(self.weights_padded.dtype).itemsize,
                     jnp.dtype(embs.dtype).itemsize)
        n_pad = plan.n_pad
        if negs is None:
            # torch.multinomial(sample_weights, S*n, replacement=True)
            # == categorical sampling proportional to sample_weights.
            negs = jax.random.categorical(key, jnp.log(self.sample_weights),
                                          shape=(s * n,))
        # Pad the O(n) index vectors (extra rows are masked in-kernel) instead
        # of jnp.pad-ing the gathered (n, S*E_pad) slab — avoids a full HBM
        # read+write of the dominant array whenever padding triggers.
        label_p = jnp.pad(jnp.asarray(label, jnp.int32), (0, n_pad - n))
        negs_p = jnp.pad(jnp.asarray(negs, jnp.int32), (0, s * (n_pad - n)))
        pos_w = jnp.take(self.weights_padded, label_p, axis=0)       # (n_pad, E_pad)
        neg_w2 = jnp.take(self.weights_padded, negs_p, axis=0).reshape(
            n_pad, s * e_pad)                                        # (n_pad, S*E_pad)
        embs_p = jnp.pad(embs, ((0, n_pad - n), (0, e_pad - embs.shape[1])))
        return _nsloss_call(embs_p, pos_w, neg_w2, n_true=n, plan=plan)


def _reference_jax(weights, embs, label, negs, num_sampled):
    """Pure-JAX reference mirroring the PyTorch forward (for sanity check)."""
    n = embs.shape[0]
    w = weights.astype(jnp.float32)
    pos_w = w[label]
    log_target = jnp.log(jax.nn.sigmoid(jnp.sum(embs * pos_w, axis=1)))
    noise = -w[negs].reshape(n, num_sampled, -1)
    scores = jnp.einsum("nse,ne->ns", noise, embs)
    sum_log_sampled = jnp.sum(jnp.log(jax.nn.sigmoid(scores)), axis=1)
    loss = log_target + sum_log_sampled
    return -jnp.sum(loss) / n


if __name__ == "__main__":
    def run_case(case_idx, num_nodes, embedding_size, num_sampled, n):
        root = jax.random.fold_in(jax.random.PRNGKey(0), case_idx)
        k_w, k_emb, k_lab, k_neg = jax.random.split(root, 4)
        node_freq = jnp.arange(1, num_nodes + 1, dtype=jnp.float32)
        model = NSLossPallas(num_nodes, node_freq, num_sampled, embedding_size, k_w)
        embs = jax.random.normal(k_emb, (n, embedding_size), dtype=jnp.float32)
        label = jax.random.randint(k_lab, (n,), 0, num_nodes)
        negs = jax.random.categorical(k_neg, jnp.log(model.sample_weights),
                                      shape=(num_sampled * n,))
        loss = jax.block_until_ready(model(n, embs, label, negs=negs))
        ref = _reference_jax(model.weights, embs, label, negs, num_sampled)
        assert jnp.allclose(loss, ref, rtol=1e-4, atol=1e-4), (case_idx, loss, ref)

    # Small deterministic configs; the second (n not a multiple of 8) exercises
    # the padded-row masking branch on every TPU generation.
    run_case(0, 64, 32, 5, 8)
    run_case(1, 96, 40, 3, 20)
    print("KERNEL_OK")
</pallas_src>

<mosaic_0001>
module attributes {stable_mosaic.version = 11 : i64} {
  func.func @_nsloss_kernel(%arg0: i32, %arg1: i32, %arg2: memref<8x128xf32, #tpu.memory_space<vmem>>, %arg3: memref<8x128xbf16, #tpu.memory_space<vmem>>, %arg4: memref<8x640xbf16, #tpu.memory_space<vmem>>, %arg5: memref<8x128xf32, #tpu.memory_space<vmem>>, %arg6: memref<1x1xf32, #tpu.memory_space<vmem>>) attributes {dimension_semantics = [#tpu.dimension_semantics<parallel>, #tpu.dimension_semantics<arbitrary>], iteration_bounds = array<i64: 1, 1>, scalar_prefetch = 0 : i64, scratch_operands = 1 : i64, tpu.core_type = #tpu.core_type<tc>, window_params = [{transform_indices = @transform_0, window_bounds = array<i64: 8, 128>}, {transform_indices = @transform_1, window_bounds = array<i64: 8, 128>}, {transform_indices = @transform_2, window_bounds = array<i64: 8, 640>}, {transform_indices = @transform_3, window_bounds = array<i64: 8, 128>}]} {
    %c0_i32 = arith.constant 0 : i32
    %0 = arith.cmpi eq, %arg1, %c0_i32 : i32
    %1 = arith.extui %0 : i1 to i32
    %c0_i32_0 = arith.constant 0 : i32
    %2 = arith.cmpi ne, %1, %c0_i32_0 : i32
    scf.if %2 {
      %cst_29 = arith.constant 0.000000e+00 : f32
      %64 = vector.broadcast %cst_29 : f32 to vector<1x1xf32>
      %c0_30 = arith.constant 0 : index
      %c0_31 = arith.constant 0 : index
      %65 = vector.load %arg6[%c0_30, %c0_31] : memref<1x1xf32, #tpu.memory_space<vmem>>, vector<1x1xf32>
      tpu.vector_store %arg6[%c0_30, %c0_31], %64 {strides = array<i32>} : memref<1x1xf32, #tpu.memory_space<vmem>>, vector<1x1xf32>,
    } else {
    }
    %c0 = arith.constant 0 : index
    %c0_1 = arith.constant 0 : index
    %3 = vector.load %arg2[%c0, %c0_1] : memref<8x128xf32, #tpu.memory_space<vmem>>, vector<8x128xf32>
    %c0_2 = arith.constant 0 : index
    %c0_3 = arith.constant 0 : index
    %4 = vector.load %arg3[%c0_2, %c0_3] : memref<8x128xbf16, #tpu.memory_space<vmem>>, vector<8x128xbf16>
    %5 = arith.extf %4 : vector<8x128xbf16> to vector<8x128xf32>
    %6 = arith.mulf %3, %5 : vector<8x128xf32>
    %cst = arith.constant dense<0.000000e+00> : vector<8xf32>
    %7 = vector.multi_reduction <add>, %6, %cst [1] : vector<8x128xf32> to vector<8xf32>
    %8 = vector.shape_cast %7 : vector<8xf32> to vector<8x1xf32>
    %c0_4 = arith.constant 0 : index
    %c0_5 = arith.constant 0 : index
    %9 = vector.load %arg4[%c0_4, %c0_5] : memref<8x640xbf16, #tpu.memory_space<vmem>>, vector<8x128xbf16>
    %10 = arith.extf %9 : vector<8x128xbf16> to vector<8x128xf32>
    %11 = arith.mulf %3, %10 : vector<8x128xf32>
    %cst_6 = arith.constant dense<0.000000e+00> : vector<8xf32>
    %12 = vector.multi_reduction <add>, %11, %cst_6 [1] : vector<8x128xf32> to vector<8xf32>
    %13 = vector.shape_cast %12 : vector<8xf32> to vector<8x1xf32>
    %cst_7 = arith.constant 0.000000e+00 : f32
    %14 = vector.broadcast %cst_7 : f32 to vector<8x1xf32>
    %15 = arith.subf %14, %13 : vector<8x1xf32>
    %c0_8 = arith.constant 0 : index
    %c128 = arith.constant 128 : index
    %16 = vector.load %arg4[%c0_8, %c128] : memref<8x640xbf16, #tpu.memory_space<vmem>>, vector<8x128xbf16>
    %17 = arith.extf %16 : vector<8x128xbf16> to vector<8x128xf32>
    %18 = arith.mulf %3, %17 : vector<8x128xf32>
    %cst_9 = arith.constant dense<0.000000e+00> : vector<8xf32>
    %19 = vector.multi_reduction <add>, %18, %cst_9 [1] : vector<8x128xf32> to vector<8xf32>
    %20 = vector.shape_cast %19 : vector<8xf32> to vector<8x1xf32>
    %cst_10 = arith.constant 0.000000e+00 : f32
    %21 = vector.broadcast %cst_10 : f32 to vector<8x1xf32>
    %22 = arith.subf %21, %20 : vector<8x1xf32>
    %c0_11 = arith.constant 0 : index
    %c256 = arith.constant 256 : index
    %23 = vector.load %arg4[%c0_11, %c256] : memref<8x640xbf16, #tpu.memory_space<vmem>>, vector<8x128xbf16>
    %24 = arith.extf %23 : vector<8x128xbf16> to vector<8x128xf32>
    %25 = arith.mulf %3, %24 : vector<8x128xf32>
    %cst_12 = arith.constant dense<0.000000e+00> : vector<8xf32>
    %26 = vector.multi_reduction <add>, %25, %cst_12 [1] : vector<8x128xf32> to vector<8xf32>
    %27 = vector.shape_cast %26 : vector<8xf32> to vector<8x1xf32>
    %cst_13 = arith.constant 0.000000e+00 : f32
    %28 = vector.broadcast %cst_13 : f32 to vector<8x1xf32>
    %29 = arith.subf %28, %27 : vector<8x1xf32>
    %c0_14 = arith.constant 0 : index
    %c384 = arith.constant 384 : index
    %30 = vector.load %arg4[%c0_14, %c384] : memref<8x640xbf16, #tpu.memory_space<vmem>>, vector<8x128xbf16>
    %31 = arith.extf %30 : vector<8x128xbf16> to vector<8x128xf32>
    %32 = arith.mulf %3, %31 : vector<8x128xf32>
    %cst_15 = arith.constant dense<0.000000e+00> : vector<8xf32>
    %33 = vector.multi_reduction <add>, %32, %cst_15 [1] : vector<8x128xf32> to vector<8xf32>
    %34 = vector.shape_cast %33 : vector<8xf32> to vector<8x1xf32>
    %cst_16 = arith.constant 0.000000e+00 : f32
    %35 = vector.broadcast %cst_16 : f32 to vector<8x1xf32>
    %36 = arith.subf %35, %34 : vector<8x1xf32>
    %c0_17 = arith.constant 0 : index
    %c512 = arith.constant 512 : index
    %37 = vector.load %arg4[%c0_17, %c512] : memref<8x640xbf16, #tpu.memory_space<vmem>>, vector<8x128xbf16>
    %38 = arith.extf %37 : vector<8x128xbf16> to vector<8x128xf32>
    %39 = arith.mulf %3, %38 : vector<8x128xf32>
    %cst_18 = arith.constant dense<0.000000e+00> : vector<8xf32>
    %40 = vector.multi_reduction <add>, %39, %cst_18 [1] : vector<8x128xf32> to vector<8xf32>
    %41 = vector.shape_cast %40 : vector<8xf32> to vector<8x1xf32>
    %cst_19 = arith.constant 0.000000e+00 : f32
    %42 = vector.broadcast %cst_19 : f32 to vector<8x1xf32>
    %43 = arith.subf %42, %41 : vector<8x1xf32>
    %44 = tpu.concatenate %8, %15, %22, %29, %36, %43 in 1 : vector<8x1xf32>, vector<8x1xf32>, vector<8x1xf32>, vector<8x1xf32>, vector<8x1xf32>, vector<8x1xf32> -> vector<8x6xf32>
    %cst_20 = arith.constant 0.000000e+00 : f32
    %45 = vector.broadcast %cst_20 : f32 to vector<8x6xf32>
    %46 = arith.minimumf %44, %45 : vector<8x6xf32>
    %47 = math.absf %44 : vector<8x6xf32>
    %cst_21 = arith.constant 0.000000e+00 : f32
    %48 = vector.broadcast %cst_21 : f32 to vector<8x6xf32>
    %49 = arith.subf %48, %47 : vector<8x6xf32>
    %50 = math.exp %49 : vector<8x6xf32>
    %51 = math.log1p %50 : vector<8x6xf32>
    %52 = arith.subf %46, %51 : vector<8x6xf32>
    %c0_22 = arith.constant 0 : index
    %c0_23 = arith.constant 0 : index
    %53 = vector.load %arg6[%c0_22, %c0_23] : memref<1x1xf32, #tpu.memory_space<vmem>>, vector<1x1xf32>
    %54 = vector.shape_cast %52 : vector<8x6xf32> to vector<1x8x6xf32>
    %cst_24 = arith.constant dense<0.000000e+00> : vector<1xf32>
    %55 = vector.multi_reduction <add>, %54, %cst_24 [1, 2] : vector<1x8x6xf32> to vector<1xf32>
    %56 = vector.shape_cast %55 : vector<1xf32> to vector<1x1x1xf32>
    %57 = vector.extract %56[0, 0, 0] : f32 from vector<1x1x1xf32>
    %58 = vector.broadcast %57 : f32 to vector<1x1xf32>
    %59 = arith.addf %53, %58 : vector<1x1xf32>
    %c0_25 = arith.constant 0 : index
    %c0_26 = arith.constant 0 : index
    %60 = vector.load %arg6[%c0_25, %c0_26] : memref<1x1xf32, #tpu.memory_space<vmem>>, vector<1x1xf32>
    tpu.vector_store %arg6[%c0_25, %c0_26], %59 {strides = array<i32>} : memref<1x1xf32, #tpu.memory_space<vmem>>, vector<1x1xf32>,
    %c0_i32_27 = arith.constant 0 : i32
    %61 = arith.cmpi eq, %arg1, %c0_i32_27 : i32
    %62 = arith.extui %61 : i1 to i32
    %c0_i32_28 = arith.constant 0 : i32
    %63 = arith.cmpi ne, %62, %c0_i32_28 : i32
    scf.if %63 {
      %c0_29 = arith.constant 0 : index
      %c0_30 = arith.constant 0 : index
      %64 = vector.load %arg6[%c0_29, %c0_30] : memref<1x1xf32, #tpu.memory_space<vmem>>, vector<1x1xf32>
      %65 = vector.shape_cast %64 : vector<1x1xf32> to vector<1x1xf32>
      %66 = vector.broadcast %65 : vector<1x1xf32> to vector<8x128xf32>
      %c0_31 = arith.constant 0 : index
      %c0_32 = arith.constant 0 : index
      %67 = vector.load %arg5[%c0_31, %c0_32] : memref<8x128xf32, #tpu.memory_space<vmem>>, vector<8x128xf32>
      tpu.vector_store %arg5[%c0_31, %c0_32], %66 {strides = array<i32>} : memref<8x128xf32, #tpu.memory_space<vmem>>, vector<8x128xf32>,
    } else {
    }
    return
  }
  func.func @transform_0(%arg0: i32, %arg1: i32) -> (i32, i32) {
    %c1_i32 = arith.constant 1 : i32
    %0 = arith.muli %arg0, %c1_i32 : i32
    %1 = arith.addi %0, %arg1 : i32
    %c0_i32 = arith.constant 0 : i32
    %c0_i32_0 = arith.constant 0 : i32
    return %1, %c0_i32 : i32, i32
  }
  func.func @transform_1(%arg0: i32, %arg1: i32) -> (i32, i32) {
    %c1_i32 = arith.constant 1 : i32
    %0 = arith.muli %arg0, %c1_i32 : i32
    %1 = arith.addi %0, %arg1 : i32
    %c0_i32 = arith.constant 0 : i32
    %c0_i32_0 = arith.constant 0 : i32
    return %1, %c0_i32 : i32, i32
  }
  func.func @transform_2(%arg0: i32, %arg1: i32) -> (i32, i32) {
    %c1_i32 = arith.constant 1 : i32
    %0 = arith.muli %arg0, %c1_i32 : i32
    %1 = arith.addi %0, %arg1 : i32
    %c0_i32 = arith.constant 0 : i32
    %c0_i32_0 = arith.constant 0 : i32
    return %1, %c0_i32 : i32, i32
  }
  func.func @transform_3(%arg0: i32, %arg1: i32) -> (i32, i32) {
    %c0_i32 = arith.constant 0 : i32
    %c0_i32_0 = arith.constant 0 : i32
    return %arg0, %c0_i32 : i32, i32
  }
}

</mosaic_0001>

<bundles_post_ra>
// kernel: tpu_custom_call.1
= control target key start
LH: loop header
LB: loop body
LE: loop exit
PB: predicated region body
PF: predicated region fallthrough
CT: control target
= control target key end

     0   :  { %8 = vsyncpa [#allocation4], 0  ;;  %s361_s0 = inlined_call_operand.hbm [shape: f32[8,128], index: 0, kind: input, shape index: {}]   ;;  %s362_s1 = inlined_call_operand.hbm [shape: bf16[8,128], index: 1, kind: input, shape index: {}]   ;;  %s363_s2 = inlined_call_operand.hbm [shape: bf16[8,640], index: 2, kind: input, shape index: {}]   ;;  %s364_s3 = inlined_call_operand.hbm [shape: f32[8,128], index: 3, kind: output, shape index: {}]  }
   0x1   :  { %9 = vsyncpa [#allocation7], 0 }
   0x2   :  { %10 = vsyncpa [#allocation5], 0  ;;  %s285_s12 = smov [#allocation6]   ;;  %s286_s14 = smov [#allocation3]  }
   0x3   :  { %s33_s13 = sshll.u32 %s285_s12, 4  ;;  %s20_s15 = sshll.u32 %s286_s14, 4  ;;  %s34_s13 = int_to_ptr.vmem [resolvable:$true] %s33_s13  ;;  %s21_s15 = int_to_ptr.vmem [resolvable:$true] %s20_s15 }
   0x4   :  { %s191_s18 = scalar_lea.hbm %s362_s1, 64 }
   0x5   :  { %p192_p0 = scmp.ne.s32.totalorder %s362_s1, %s191_s18  ;;  %p195_p1 = scmp.lt.u32.totalorder %s191_s18, %s362_s1 }
   0x7   :  { %p197_p2 = pnand %p195_p1, %p192_p0 }
   0x9   :  { %200 = shalt.err (!%p197_p2)
}
   0xa   :  { %s201_s23 = scalar_lea.vmem %s34_s13, 64  ;;  %p206_p4 = scmp.lt.s32.totalorder %s34_s13, %s34_s13 }
   0xb   :  { %p202_p3 = scmp.ne.s32.totalorder %s34_s13, %s201_s23  ;;  %p207_p5 = scmp.lt.s32.totalorder %s201_s23, %s201_s23 }
   0xd   :  { %p208_p6 = por %p207_p5, %p206_p4 }
   0xf   :  { %p209_p7 = pnand %p208_p6, %p202_p3 }
  0x11   :  { %212 = shalt.err (!%p209_p7)
}
  0x12   :  { %36 = dma.hbm_to_vmem [thread:$0]  %s362_s1, 64, %s34_s13, [#allocation7]  }
  0x13   :  { %s213_s28 = scalar_lea.hbm %s361_s0, 128 }
  0x14   :  { %p214_p8 = scmp.ne.s32.totalorder %s361_s0, %s213_s28  ;;  %p217_p9 = scmp.lt.u32.totalorder %s213_s28, %s361_s0 }
  0x16   :  { %p219_p10 = pnand %p217_p9, %p214_p8 }
  0x18   :  { %222 = shalt.err (!%p219_p10)
}
  0x19   :  { %s223_s6 = scalar_lea.vmem %s21_s15, 128  ;;  %p228_p12 = scmp.lt.s32.totalorder %s21_s15, %s21_s15 }
  0x1a   :  { %p224_p11 = scmp.ne.s32.totalorder %s21_s15, %s223_s6  ;;  %p229_p13 = scmp.lt.s32.totalorder %s223_s6, %s223_s6 }
  0x1c   :  { %p230_p0 = por %p229_p13, %p228_p12 }
  0x1e   :  { %p231_p1 = pnand %p230_p0, %p224_p11 }
  0x20   :  { %234 = shalt.err (!%p231_p1)
}
  0x21   :  { %23 = dma.hbm_to_vmem [thread:$0]  %s361_s0, 128, %s21_s15, [#allocation4]  }
  0x22   :  { %s287_s8 = smov [#allocation8]   ;;  %s235_s12 = scalar_lea.hbm %s363_s2, 320 }
  0x23   :  { %s47_s9 = sshll.u32 %s287_s8, 4  ;;  %p236_p2 = scmp.ne.s32.totalorder %s363_s2, %s235_s12  ;;  %s48_s9 = int_to_ptr.vmem [resolvable:$true] %s47_s9 }
  0x24   :  { %p239_p3 = scmp.lt.u32.totalorder %s235_s12, %s363_s2 }
  0x26   :  { %p241_p4 = pnand %p239_p3, %p236_p2 }
  0x28   :  { %244 = shalt.err (!%p241_p4)
}
  0x29   :  { %s245_s18 = scalar_lea.vmem %s48_s9, 320  ;;  %p250_p6 = scmp.lt.s32.totalorder %s48_s9, %s48_s9 }
  0x2a   :  { %p246_p5 = scmp.ne.s32.totalorder %s48_s9, %s245_s18  ;;  %p251_p7 = scmp.lt.s32.totalorder %s245_s18, %s245_s18 }
  0x2c   :  { %p252_p8 = por %p251_p7, %p250_p6 }
  0x2e   :  { %p253_p9 = pnand %p252_p8, %p246_p5 }
  0x30   :  { %256 = shalt.err (!%p253_p9)
}
  0x31   :  { %50 = dma.hbm_to_vmem [thread:$0]  %s363_s2, 320, %s48_s9, [#allocation7]  }
  0x32   :  { %279 = dma.done.wait [#allocation4], 128  }
  0x33   :  { %280 = vsyncadd [#allocation4], 4294967168 }
  0x34   :  { %281 = dma.done.wait [#allocation7], 384  }
  0x35   :  { %282 = vsyncadd [#allocation7], 4294966912  ;;  %v69_v0 = vld [vmem:[#allocation3] sm:$0xff]  ;;  %v75_v1 = vld [vmem:[#allocation8] sm:$0xff]   ;;  %vm105_vm0 = vcmask 7168   ;;  %vm107_vm1 = vcmask 15360  }
  0x36   :  { %v70_v2 = vld [vmem:[#allocation6] sm:$0xf]  ;;  %v76_v3 = vunpack.c.l.bf16 %v75_v1  ;;  %v82_v5 = vunpack.c.h.bf16 %v75_v1  ;;  %v87_v6 = vld [vmem:[#allocation8 + $0x8] sm:$0xff]   ;;  %v99_v8 = vld [vmem:[#allocation8 + $0x10] sm:$0xf]  ;;  %vm109_vm2 = vcmask 23552  }
  0x37   :  { %v71_v4 = vunpack.c.l.bf16 %v70_v2  ;;  %v88_v7 = vunpack.c.l.bf16 %v87_v6  ;;  %v94_v13 = vunpack.c.h.bf16 %v87_v6  ;;  %v100_v14 = vunpack.c.l.bf16 %v99_v8  ;;  %s290_s19 = smov [#allocation9]  }
  0x38   :  { %v77_v9 = vmul.f32 %v76_v3, %v69_v0  ;;  %v83_v11 = vmul.f32 %v82_v5, %v69_v0  ;;  %vm111_vm3 = vcmask 31744   ;;  %vm113_vm4 = vcmask 39936   ;;  %s166_s20 = sshll.u32 %s290_s19, 4  ;;  %s167_s20 = int_to_ptr.vmem [resolvable:$true] %s166_s20 }
  0x39   :  { %v72_v10 = vmul.f32 %v71_v4, %v69_v0  ;;  %v89_v12 = vmul.f32 %v88_v7, %v69_v0  ;;  %v95_v15 = vmul.f32 %v94_v13, %v69_v0  ;;  %v101_v16 = vmul.f32 %v100_v14, %v69_v0  ;;  %s257_s21 = scalar_lea.vmem %s167_s20, 128  ;;  %p262_p11 = scmp.lt.s32.totalorder %s167_s20, %s167_s20 }
  0x3a   :  { %78 = vadd.xlane.f32.xlu0 %v77_v9  ;;  %vm131_vm6 = vcmask 48128   ;;  %vm67_vm7 = vcmask 0   ;;  %v288_v48 = vmov 0.0   ;;  %v289_v49 = vmov 0   ;;  %p258_p10 = scmp.ne.s32.totalorder %s167_s20, %s257_s21  ;;  %p263_p12 = scmp.lt.s32.totalorder %s257_s21, %s257_s21 }
  0x3b   :  { %73 = vadd.xlane.f32.xlu1 %v72_v10  ;;  %68 = vst.msk [vmem:[#allocation2] sm:$0x1] %vm67_vm7, %v288_v48  ;;  %186 = vset.pattern.permute.xlu0 %v289_v49 }
  0x3c   :  { %185 = vset.pattern.permute.xlu1 %v289_v49  ;;  %p264_p13 = por %p263_p12, %p262_p11 }
  0x3e   :  { %84 = vadd.xlane.f32.xlu0 %v83_v11  ;;  %p265_p0 = pnand %p264_p13, %p258_p10 }
  0x3f   :  { %90 = vadd.xlane.f32.xlu1 %v89_v12 }
  0x42   :  { %96 = vadd.xlane.f32.xlu0 %v95_v15  ;;  %v130_v57 = vld [vmem:[#allocation2] sm:$0x1] }
  0x43   :  { %102 = vadd.xlane.f32.xlu1 %v101_v16 }
  0xc7   :  { %v79_v17 = vpop.xlane.xlu0 %78 }
  0xc8   :  { %v74_v18 = vpop.xlane.xlu1 %73  ;;  %v80_v19 = vsub.f32 0.0, %v79_v17 }
  0xca   :  { %v106_v23 = vsel %vm105_vm0, %v74_v18, %v80_v19 }
  0xcb   :  { %v85_v20 = vpop.xlane.xlu0 %84 }
  0xcc   :  { %v91_v21 = vpop.xlane.xlu1 %90  ;;  %v86_v22 = vsub.f32 0.0, %v85_v20 }
  0xcd   :  { %v92_v24 = vsub.f32 0.0, %v91_v21 }
  0xce   :  { %v108_v25 = vsel %vm107_vm1, %v106_v23, %v86_v22 }
  0xcf   :  { %v97_v26 = vpop.xlane.xlu0 %96  ;;  %v110_v30 = vsel %vm109_vm2, %v108_v25, %v92_v24 }
  0xd0   :  { %v103_v27 = vpop.xlane.xlu1 %102  ;;  %v98_v28 = vsub.f32 0.0, %v97_v26 }
  0xd1   :  { %v104_v29 = vsub.f32 0.0, %v103_v27 }
  0xd2   :  { %v112_v31 = vsel %vm111_vm3, %v110_v30, %v98_v28 }
  0xd3   :  { %v114_v32 = vsel %vm113_vm4, %v112_v31, %v104_v29 }
  0xd4   :  { %v116_v33 = vand.u32 2147483647, %v114_v32  ;;  %v115_v44 = vmin.f32 %v114_v32, 0.0 }
  0xd6   :  { %v117_v34 = vsub.f32 0.0, %v116_v33 }
  0xd8   :  { %v118_v35 = vmul.f32 1.442695, %v117_v34 }
  0xda   :  { %187 = vpow2.f32 %v118_v35 }
  0xe4   :  { %v188_v36 = vpop.eup %187 }
  0xe5   :  { %v120_v37 = vadd.f32 1.0, %v188_v36  ;;  %v123_v38 = vmul.f32 -0.5, %v188_v36  ;;  %v126_v40 = vand.u32 2147483647, %v188_v36 }
  0xe7   :  { %189 = vlog2.f32 %v120_v37  ;;  %v124_v39 = vadd.f32 1.0, %v123_v38  ;;  %vm127_vm5 = vcmp.lt.f32.partialorder %v126_v40, 0.0004427343 }
  0xe9   :  { %v125_v43 = vmul.f32 %v188_v36, %v124_v39 }
  0xf1   :  { %v190_v41 = vpop.eup %189 }
  0xf2   :  { %v122_v42 = vmul.f32 0.6931472, %v190_v41 }
  0xf4   :  { %v128_v45 = vsel %vm127_vm5, %v125_v43, %v122_v42 }
  0xf5   :  { %v129_v46 = vsub.f32 %v115_v44, %v128_v45 }
  0xf7   :  { %v132_v47 = vsel %vm131_vm6, %v129_v46, 0.0 }
  0xf8   :  { %133 = vadd.xlane.f32.xlu0 %v132_v47 }
 0x185   :  { %v134_v50 = vpop.xlane.xlu0 %133 }
 0x186   :  { %v135_v51 = vrot.slane %v134_v50, 4 }
 0x188   :  { %v136_v52 = vadd.f32 %v135_v51, %v134_v50 }
 0x18a   :  { %v137_v53 = vrot.slane %v136_v52, 2 }
 0x18c   :  { %v138_v54 = vadd.f32 %v137_v53, %v136_v52 }
 0x18e   :  { %v139_v55 = vrot.slane %v138_v54, 1 }
 0x190   :  { %v140_v56 = vadd.f32 %v139_v55, %v138_v54 }
 0x192   :  { %177 = vpush %v140_v56 }
 0x1c3   :  { %s178_s2 = spop %177 }
 0x1c4   :  { %v142_v58 = vstv %s178_s2 }
 0x1c5   :  { %v143_v59 = vadd.f32 %v142_v58, %v130_v57 }
 0x1c7   :  { %145 = vst.msk [vmem:[#allocation2] sm:$0x1] %vm67_vm7, %v143_v59 }
 0x1ce   :  { %v176_v60 = vld [vmem:[#allocation2] ss:$0 sm:$0xff] }
 0x1cf   :  { %156 = vperm.xlu1 %185, %v176_v60  }
 0x24e   :  { %v157_v61 = vpop.permute.xlu1 %156 }
 0x24f   :  { %159 = vst [vmem:[#allocation9] sm:$0xff] %v157_v61 }
 0x250   :  { %268 = shalt.err (!%p265_p0)
}
 0x251   :  { %s269_s24 = scalar_lea.hbm %s364_s3, 128 }
 0x252   :  { %p270_p1 = scmp.ne.s32.totalorder %s364_s3, %s269_s24  ;;  %p273_p2 = scmp.lt.u32.totalorder %s269_s24, %s364_s3 }
 0x254   :  { %p275_p3 = pnand %p273_p2, %p270_p1 }
 0x256   :  { %278 = shalt.err (!%p275_p3)
}
 0x257   :  { %169 = dma.vmem_to_hbm [thread:$0]  %s167_s20, 128, %s364_s3, [#allocation5]  }
 0x258   :  { %283 = dma.done.wait [#allocation5], 128  }
 0x259   :  { %284 = vsyncadd [#allocation5], 4294967168 }
 0x25a   :  { %173 = vsyncpa [#allocation4], 1 }
 0x25b   :  { %174 = vsyncpa [#allocation7], 1 }
 0x25c   :  { %175 = vsyncpa [#allocation5], 1 }

</bundles_post_ra>
